<compile_context>
chip_gen: v7x
topology: tpu7x:2x2x1
jax: 0.10.0
libtpu: 0.0.40
codegen_flags: <defaults>
</compile_context>

<pallas_src>
import functools

import jax
import jax.numpy as jnp
import numpy as np
from jax.experimental import pallas as pl
from jax.experimental.pallas import tpu as pltpu


# ----------------------------- Pallas kernel ---------------------------------

def _matmul_act_kernel(p_ref, w_ref, o_ref, *, activation, slope):
    # p (tm, Kdim) bf16 im2col patches, w (Kdim, N) bf16, out (tm, N) f32
    y = jnp.dot(p_ref[...], w_ref[...], preferred_element_type=jnp.float32)
    if activation == "leaky_relu":
        y = jnp.where(y >= 0, y, slope * y)
    elif activation == "sigmoid":
        y = 1.0 / (1.0 + jnp.exp(-y))
    o_ref[...] = y.astype(o_ref.dtype)


def matmul_act(patches, wmat, *, activation, slope=0.2, out_dtype=jnp.float32):
    """Fused (patches @ wmat) + activation. patches/wmat are bf16, accumulate f32."""
    M, K = patches.shape
    Kw, N = wmat.shape
    assert K == Kw
    # Row tile: biggest of 512/256/128 that divides M (big tiles amortize the
    # ~0.35us per-step overhead); otherwise the whole array as one block.
    tm = M
    for cand in (512, 256, 128):
        if M % cand == 0:
            tm = cand
            break
    flops = 2 * M * K * N
    transcendentals = M * N if activation == "sigmoid" else 0
    bytes_accessed = (M * K + K * N) * patches.dtype.itemsize \
        + M * N * jnp.dtype(out_dtype).itemsize
    return pl.pallas_call(
        functools.partial(_matmul_act_kernel, activation=activation, slope=slope),
        out_shape=jax.ShapeDtypeStruct((M, N), out_dtype),
        grid=(M // tm,),
        in_specs=[
            pl.BlockSpec((tm, K), lambda i: (i, 0)),   # row tile of patches
            pl.BlockSpec((K, N), lambda i: (0, 0)),    # whole weight resident
        ],
        out_specs=pl.BlockSpec((tm, N), lambda i: (i, 0)),
        compiler_params=pltpu.CompilerParams(
            dimension_semantics=("parallel",),
            vmem_limit_bytes=32 * 1024 * 1024),
        cost_estimate=pl.CostEstimate(flops=flops,
                                      transcendentals=transcendentals,
                                      bytes_accessed=bytes_accessed),
    )(patches, wmat)


# --------------------------- Conv2d (im2col + MXU) ----------------------------

def conv2d_pallas(x_nhwc, w_oihw, *, stride, padding, activation, slope=0.2):
    """Conv2d (PyTorch semantics, bias=False) on NHWC input with fused activation.

    x_nhwc: (B, H, W, Cin) float32 ; w_oihw: (Cout, Cin, K, K) float32
    returns (B, Ho, Wo, Cout) float32 (stays NHWC for the next layer).
    """
    B, H, W, Cin = x_nhwc.shape
    Cout, _, K, _ = w_oihw.shape
    Ho = (H + 2 * padding - K) // stride + 1
    Wo = (W + 2 * padding - K) // stride + 1

    xb = x_nhwc.astype(jnp.bfloat16)
    if padding:
        xb = jnp.pad(xb, ((0, 0), (padding, padding), (padding, padding), (0, 0)))

    # im2col on NHWC: columns ordered (kh, kw, cin), cin fastest.
    cols = []
    for kh in range(K):
        for kw in range(K):
            cols.append(xb[:, kh:kh + (Ho - 1) * stride + 1:stride,
                           kw:kw + (Wo - 1) * stride + 1:stride, :])
    patches = jnp.concatenate(cols, axis=-1).reshape(B * Ho * Wo, K * K * Cin)

    # (Cout, Cin, K, K) -> (K, K, Cin, Cout) -> (K*K*Cin, Cout); matches patch order.
    wmat = jnp.transpose(w_oihw, (2, 3, 1, 0)).reshape(K * K * Cin, Cout)
    wmat = wmat.astype(jnp.bfloat16)

    out = matmul_act(patches, wmat, activation=activation, slope=slope)
    return out.reshape(B, Ho, Wo, Cout)


def conv2d_head(x_nhwc, w_oihw, *, apply_sigmoid):
    """Final Conv2d(4df -> 1, k4 s1 p0) on a 4x4 NHWC map (+ optional fused sigmoid).

    Weight columns padded to 128 so the Pallas output store is lane-dense.
    """
    B, H, W, Cin = x_nhwc.shape
    Cout, _, K, _ = w_oihw.shape            # Cout == 1, K == H == W
    patches = x_nhwc.astype(jnp.bfloat16).reshape(B, H * W * Cin)   # (h,w,c) order
    wmat = jnp.transpose(w_oihw, (2, 3, 1, 0)).reshape(K * K * Cin, Cout)
    wmat = jnp.pad(wmat, ((0, 0), (0, 128 - Cout))).astype(jnp.bfloat16)
    out = matmul_act(patches, wmat,
                     activation="sigmoid" if apply_sigmoid else "none")
    return out[:, :Cout].reshape(B, Cout, 1, 1)     # (B, 1, 1, 1), NCHW-compatible


# ------------------------------ Spectral norm ---------------------------------

def spectral_normalize(w, u0, n_iters=3, eps=1e-12):
    """PyTorch spectral_norm semantics: W / sigma, sigma via power iteration on
    W.view(Cout, -1).  Pure-JAX glue (tiny), shared by kernel path and reference."""
    w_mat = w.reshape(w.shape[0], -1)
    u = u0
    v = w_mat.T @ u
    for _ in range(n_iters):
        v = w_mat.T @ u
        v = v / (jnp.linalg.norm(v) + eps)
        u = w_mat @ v
        u = u / (jnp.linalg.norm(u) + eps)
    sigma = u @ (w_mat @ v)
    return w / sigma


# ----------------------------- Full forward pass ------------------------------

def dcgan_spectral_discriminator_forward(params, image, labels, *, img_size,
                                         feat_matching=False):
    B = image.shape[0]
    emb = params["embed"][labels].reshape(B, 1, img_size, img_size)
    x = jnp.concatenate([image, emb], axis=1)          # NCHW (B, C_img+1, S, S)
    x = jnp.transpose(x, (0, 2, 3, 1))                 # NHWC once; stays NHWC

    w1 = spectral_normalize(params["w1"], params["u1"])
    w2 = spectral_normalize(params["w2"], params["u2"])
    w3 = spectral_normalize(params["w3"], params["u3"])
    w4 = spectral_normalize(params["w4"], params["u4"])

    h = conv2d_pallas(x, w1, stride=2, padding=1, activation="leaky_relu")  # (B,16,16,df)
    h = conv2d_pallas(h, w2, stride=2, padding=1, activation="leaky_relu")  # (B, 8, 8,2df)
    h = conv2d_pallas(h, w3, stride=2, padding=1, activation="leaky_relu")  # (B, 4, 4,4df)
    # feat_matching returns the pre-sigmoid features of the final conv
    return conv2d_head(h, w4, apply_sigmoid=not feat_matching)              # (B,1,1,1)


# ----------------------------- Pure-JAX reference -----------------------------

def _ref_conv(x_nchw, w, *, stride, padding):
    return jax.lax.conv_general_dilated(
        x_nchw.astype(jnp.bfloat16), w.astype(jnp.bfloat16),
        window_strides=(stride, stride),
        padding=((padding, padding), (padding, padding)),
        dimension_numbers=("NCHW", "OIHW", "NCHW"),
        preferred_element_type=jnp.float32)


def reference_forward(params, image, labels, *, img_size, feat_matching=False):
    B = image.shape[0]
    emb = params["embed"][labels].reshape(B, 1, img_size, img_size)
    x = jnp.concatenate([image, emb], axis=1)
    w1 = spectral_normalize(params["w1"], params["u1"])
    w2 = spectral_normalize(params["w2"], params["u2"])
    w3 = spectral_normalize(params["w3"], params["u3"])
    w4 = spectral_normalize(params["w4"], params["u4"])
    lrelu = lambda t: jnp.where(t >= 0, t, 0.2 * t)
    h = lrelu(_ref_conv(x, w1, stride=2, padding=1))
    h = lrelu(_ref_conv(h, w2, stride=2, padding=1))
    h = lrelu(_ref_conv(h, w3, stride=2, padding=1))
    feats = _ref_conv(h, w4, stride=1, padding=0)      # (B, 1, 1, 1)
    if feat_matching:
        return feats
    return jax.nn.sigmoid(feats)


# ----------------------------------- Main --------------------------------------

if __name__ == "__main__":
    channels_img = 3
    disc_features = 8          # df -> layer widths 8, 16, 32
    num_classes = 10
    img_size = 32              # 32 -> 16 -> 8 -> 4 -> 1 (k4 s1 p0 head)
    batch = 4
    dtype = jnp.float32

    key = jax.random.PRNGKey(0)
    ks = jax.random.split(key, 11)
    s = 0.05
    params = {
        "embed": s * jax.random.normal(ks[0], (num_classes, img_size * img_size), dtype),
        "w1": s * jax.random.normal(ks[1], (disc_features, channels_img + 1, 4, 4), dtype),
        "w2": s * jax.random.normal(ks[2], (disc_features * 2, disc_features, 4, 4), dtype),
        "w3": s * jax.random.normal(ks[3], (disc_features * 4, disc_features * 2, 4, 4), dtype),
        "w4": s * jax.random.normal(ks[4], (1, disc_features * 4, 4, 4), dtype),
        # spectral-norm power-iteration vectors (PyTorch keeps one u per weight)
        "u1": jax.random.normal(ks[5], (disc_features,), dtype),
        "u2": jax.random.normal(ks[6], (disc_features * 2,), dtype),
        "u3": jax.random.normal(ks[7], (disc_features * 4,), dtype),
        "u4": jax.random.normal(ks[8], (1,), dtype),
    }

    # "noise" in the PyTorch forward is the input image batch, NCHW.
    image = jax.random.normal(ks[9], (batch, channels_img, img_size, img_size), dtype)
    labels = jax.random.randint(ks[10], (batch,), 0, num_classes)

    out = dcgan_spectral_discriminator_forward(params, image, labels, img_size=img_size)
    out = jax.block_until_ready(out)

    ref = reference_forward(params, image, labels, img_size=img_size)
    ref = jax.block_until_ready(ref)

    assert out.shape == (batch, 1, 1, 1), out.shape
    np.testing.assert_allclose(np.asarray(out), np.asarray(ref), rtol=1e-2, atol=1e-2)
    print("KERNEL_OK")
</pallas_src>

<mosaic_0001>
module attributes {stable_mosaic.version = 11 : i64} {
  func.func @_matmul_act_kernel(%arg0: i32, %arg1: memref<512x64xbf16, #tpu.memory_space<vmem>>, %arg2: memref<64x8xbf16, #tpu.memory_space<vmem>>, %arg3: memref<512x8xf32, #tpu.memory_space<vmem>>) attributes {dimension_semantics = [#tpu.dimension_semantics<parallel>], iteration_bounds = array<i64: 2>, scalar_prefetch = 0 : i64, scratch_operands = 0 : i64, tpu.core_type = #tpu.core_type<tc>, window_params = [{transform_indices = @transform_0, window_bounds = array<i64: 512, 64>}, {pipeline_mode = #tpu.pipeline_mode<synchronous>, transform_indices = @transform_1, window_bounds = array<i64: 64, 8>}, {transform_indices = @transform_2, window_bounds = array<i64: 512, 8>}]} {
    %c0 = arith.constant 0 : index
    %c0_0 = arith.constant 0 : index
    %0 = vector.load %arg1[%c0, %c0_0] : memref<512x64xbf16, #tpu.memory_space<vmem>>, vector<512x64xbf16>
    %c0_1 = arith.constant 0 : index
    %c0_2 = arith.constant 0 : index
    %1 = vector.load %arg2[%c0_1, %c0_2] : memref<64x8xbf16, #tpu.memory_space<vmem>>, vector<64x8xbf16>
    %cst = arith.constant dense<0.000000e+00> : vector<512x8xf32>
    %2 = tpu.matmul %0, %1, %cst {dimension_numbers = #tpu.dot_dimension_numbers<[1], [0], [0], [1], [0, 0, 1, 1], [], []>} : vector<512x64xbf16>, vector<64x8xbf16>, vector<512x8xf32> -> vector<512x8xf32>
    %cst_3 = arith.constant 0.000000e+00 : f32
    %3 = vector.broadcast %cst_3 : f32 to vector<512x8xf32>
    %4 = arith.cmpf oge, %2, %3 : vector<512x8xf32>
    %cst_4 = arith.constant 2.000000e-01 : f32
    %5 = vector.broadcast %cst_4 : f32 to vector<512x8xf32>
    %6 = arith.mulf %5, %2 : vector<512x8xf32>
    %7 = arith.select %4, %2, %6 : vector<512x8xi1>, vector<512x8xf32>
    %c0_5 = arith.constant 0 : index
    %c0_6 = arith.constant 0 : index
    %8 = vector.load %arg3[%c0_5, %c0_6] : memref<512x8xf32, #tpu.memory_space<vmem>>, vector<512x8xf32>
    tpu.vector_store %arg3[%c0_5, %c0_6], %7 {strides = array<i32>} : memref<512x8xf32, #tpu.memory_space<vmem>>, vector<512x8xf32>,
    return
  }
  func.func @transform_0(%arg0: i32) -> (i32, i32) {
    %c0_i32 = arith.constant 0 : i32
    %c0_i32_0 = arith.constant 0 : i32
    return %arg0, %c0_i32 : i32, i32
  }
  func.func @transform_1(%arg0: i32) -> (i32, i32) {
    %c0_i32 = arith.constant 0 : i32
    %c0_i32_0 = arith.constant 0 : i32
    %c0_i32_1 = arith.constant 0 : i32
    return %c0_i32, %c0_i32_0 : i32, i32
  }
  func.func @transform_2(%arg0: i32) -> (i32, i32) {
    %c0_i32 = arith.constant 0 : i32
    %c0_i32_0 = arith.constant 0 : i32
    return %arg0, %c0_i32 : i32, i32
  }
}

</mosaic_0001>

<bundles_post_ra>
// kernel: tpu_custom_call.1
= control target key start
LH: loop header
LB: loop body
LE: loop exit
PB: predicated region body
PF: predicated region fallthrough
CT: control target
= control target key end

     0   :  { %s1365_s9 = smov 0   ;;  %s1594_s0 = inlined_call_operand.vmem [shape: bf16[1024,64], index: 0, kind: input, shape index: {}]   ;;  %s1595_s1 = inlined_call_operand.vmem [shape: bf16[64,8], index: 1, kind: input, shape index: {}]   ;;  %s1596_s2 = inlined_call_operand.vmem [shape: f32[1024,8], index: 2, kind: output, shape index: {}]  }
   0x1 LB: > { %s1103_s10 = sadd.s32 4294967295, %s1348_s9   ;;  %p1107_p0 = scmp.ge.s32.totalorder %s1348_s9, 1  ;;  %s1348_s9 = sphi %s1365_s9, %s12_s9  }
   0x2   : > { %p113_p1 = scmp.lt.s32.totalorder %s1348_s9, 3 }
   0x4   : > { %p114_p2 = pnand %p1107_p0, %p113_p1 }
   0x5   : > { %v1306_v0 = vld [vmem:[%s1595_s1] sm:$0xff] (!%p114_p2)   ;;  %s1108_s13 = sshll.u32 (!%p114_p2), %s1103_s10, 6  ;;  %v1307_v1 = vld [vmem:[%s1595_s1 + $0x8] sm:$0xff] (!%p114_p2)   ;;  %v1308_v2 = vld [vmem:[%s1595_s1 + $0x10] sm:$0xff] (!%p114_p2)   ;;  %vm404_vm0 = vcmask (!%p114_p2), 523264   ;;  %vm982_vm1 = vcmask (!%p114_p2), 64512  }
   0x6   : > { %117 = sbr.rel (%p114_p2) target bundleno = 300 (0x12c), region = 28  ;;  %p136_p3 = scmp.lt.s32.totalorder (!%p114_p2), %s1108_s13, 127  ;;  %1218 = vmatprep.subr.bf16.mxu0 (!%p114_p2), %v1306_v0  ;;  %1290 = vmatprep.subr.bf16.mxu1 (!%p114_p2), %v1306_v0  ;;  %v1309_v3 = vld [vmem:[%s1595_s1 + $0x18] sm:$0xff] (!%p114_p2)  }
   0x7   : > { %1219 = vmatpush3.bf16.msra.mxu0 (!%p114_p2), %v1306_v0  ;;  %1294 = vmatpush3.bf16.msra.mxu1 (!%p114_p2), %v1306_v0 }
   0x8   : > { %1220 = vmatprep.subr.bf16.mxu0 (!%p114_p2), %v1307_v1  ;;  %1291 = vmatprep.subr.bf16.mxu1 (!%p114_p2), %v1307_v1 }
   0xb   : > { %1221 = vmatpush3.bf16.msra.mxu0 (!%p114_p2), %v1307_v1  ;;  %1295 = vmatpush3.bf16.msra.mxu1 (!%p114_p2), %v1307_v1 }
   0xc   : > { %1222 = vmatprep.subr.bf16.mxu0 (!%p114_p2), %v1308_v2  ;;  %1292 = vmatprep.subr.bf16.mxu1 (!%p114_p2), %v1308_v2 }
   0xd   : > { %s1598_s13 = smov (!%p136_p3, %s1108_s13), 127 }
   0xe   : > { %s1109_s18 = sshll.u32 %s1598_s13, 2  ;;  %s1111_s24 = sshll.u32 %s1598_s13, 3 }
   0xf   : > { %s1391_s23 = scalar_lea.vmem %s1594_s0, %s1109_s18  ;;  %1223 = vmatpush3.bf16.msra.mxu0 %v1308_v2  ;;  %1296 = vmatpush3.bf16.msra.mxu1 %v1308_v2  ;;  %s1461_s27 = scalar_lea.vmem %s1596_s2, %s1111_s24 }
  0x10   : > { %v1310_v4 = vld [vmem:[%s1391_s23] sm:$0xff]   ;;  %1224 = vmatprep.subr.bf16.mxu0 %v1309_v3  ;;  %1293 = vmatprep.subr.bf16.mxu1 %v1309_v3  ;;  %v1312_v6 = vld [vmem:[%s1391_s23 + $0x8] sm:$0xff]   ;;  %v1314_v8 = vld [vmem:[%s1391_s23 + $0x10] sm:$0xff]  }
  0x11   : > { %v1311_v5 = vld [vmem:[%s1391_s23 + $0x80] sm:$0xff]   ;;  %1226 = vmatprep.mubr.msk.bf16.mxu0 %vm404_vm0, %v1310_v4  ;;  %v1313_v7 = vld [vmem:[%s1391_s23 + $0x88] sm:$0xff]   ;;  %v1315_v9 = vld [vmem:[%s1391_s23 + $0x90] sm:$0xff]  }
  0x12   : > { %1258 = vmatprep.mubr.msk.bf16.mxu1 %vm404_vm0, %v1311_v5  ;;  %v1316_v10 = vld [vmem:[%s1391_s23 + $0x18] sm:$0xff]   ;;  %v1318_v12 = vld [vmem:[%s1391_s23 + $0x20] sm:$0xff]   ;;  %v1320_v14 = vld [vmem:[%s1391_s23 + $0x28] sm:$0xff]  }
  0x13   : > { %1225 = vmatpush3.bf16.msra.mxu0 %v1309_v3  ;;  %1297 = vmatpush3.bf16.msra.mxu1 %v1309_v3  ;;  %v1317_v11 = vld [vmem:[%s1391_s23 + $0x98] sm:$0xff]   ;;  %v1319_v13 = vld [vmem:[%s1391_s23 + $0xa0] sm:$0xff]   ;;  %v1321_v15 = vld [vmem:[%s1391_s23 + $0xa8] sm:$0xff]  }
  0x14   : > { %v1322_v16 = vld [vmem:[%s1391_s23 + $0x30] sm:$0xff]   ;;  %v1324_v18 = vld [vmem:[%s1391_s23 + $0x38] sm:$0xff]   ;;  %v1326_v20 = vld [vmem:[%s1391_s23 + $0x40] sm:$0xff]  }
  0x15   : > { %v1323_v17 = vld [vmem:[%s1391_s23 + $0xb0] sm:$0xff]   ;;  %v1325_v19 = vld [vmem:[%s1391_s23 + $0xb8] sm:$0xff]   ;;  %v1327_v21 = vld [vmem:[%s1391_s23 + $0xc0] sm:$0xff]  }
  0x16   : > { %1227 = vmatmul.mubr.msk.bf16.vlgmr.msra.gmra.mrb[0].mxu0 %vm404_vm0, %v1312_v6  ;;  %1259 = vmatmul.mubr.msk.bf16.vlgmr.msra.gmra.mrb[0].mxu1 %vm404_vm0, %v1313_v7  ;;  %v1328_v22 = vld [vmem:[%s1391_s23 + $0x48] sm:$0xff]   ;;  %v1330_v24 = vld [vmem:[%s1391_s23 + $0x50] sm:$0xff]   ;;  %v1332_v26 = vld [vmem:[%s1391_s23 + $0x58] sm:$0xff]  }
  0x17   : > { %1230 = vmatprep.mubr.msk.bf16.mxu0 %vm404_vm0, %v1314_v8  ;;  %1262 = vmatprep.mubr.msk.bf16.mxu1 %vm404_vm0, %v1315_v9  ;;  %v1329_v23 = vld [vmem:[%s1391_s23 + $0xc8] sm:$0xff]   ;;  %v1331_v25 = vld [vmem:[%s1391_s23 + $0xd0] sm:$0xff]   ;;  %v1333_v27 = vld [vmem:[%s1391_s23 + $0xd8] sm:$0xff]  }
  0x18   : > { %v1334_v28 = vld [vmem:[%s1391_s23 + $0x60] sm:$0xff]   ;;  %v1336_v30 = vld [vmem:[%s1391_s23 + $0x68] sm:$0xff]   ;;  %v1338_v32 = vld [vmem:[%s1391_s23 + $0x70] sm:$0xff]  }
  0x19   : > { %v1335_v29 = vld [vmem:[%s1391_s23 + $0xe0] sm:$0xff]   ;;  %v1337_v31 = vld [vmem:[%s1391_s23 + $0xe8] sm:$0xff]   ;;  %v1339_v33 = vld [vmem:[%s1391_s23 + $0xf0] sm:$0xff]  }
  0x1a   : > { %v1340_v34 = vld [vmem:[%s1391_s23 + $0x78] sm:$0xff]  }
  0x1b   : > { %v1341_v35 = vld [vmem:[%s1391_s23 + $0xf8] sm:$0xff]  }
  0x1e   : > { %1231 = vmatmul.mubr.msk.bf16.gmra.mrb[4].mxu0 %vm404_vm0, %v1316_v10  ;;  %1263 = vmatmul.mubr.msk.bf16.gmra.mrb[4].mxu1 %vm404_vm0, %v1317_v11 }
  0x1f   : > { %1234 = vmatprep.mubr.msk.bf16.mxu0 %vm404_vm0, %v1318_v12  ;;  %1266 = vmatprep.mubr.msk.bf16.mxu1 %vm404_vm0, %v1319_v13 }
  0x26   : > { %1235 = vmatmul.mubr.msk.bf16.gmra.mrb[8].mxu0 %vm404_vm0, %v1320_v14  ;;  %1267 = vmatmul.mubr.msk.bf16.gmra.mrb[8].mxu1 %vm404_vm0, %v1321_v15 }
  0x27   : > { %1238 = vmatprep.mubr.msk.bf16.mxu0 %vm404_vm0, %v1322_v16  ;;  %1270 = vmatprep.mubr.msk.bf16.mxu1 %vm404_vm0, %v1323_v17 }
  0x2e   : > { %1239 = vmatmul.mubr.msk.bf16.gmra.mrb[12].mxu0 %vm404_vm0, %v1324_v18  ;;  %1271 = vmatmul.mubr.msk.bf16.gmra.mrb[12].mxu1 %vm404_vm0, %v1325_v19 }
  0x2f   : > { %1242 = vmatprep.mubr.msk.bf16.mxu0 %vm404_vm0, %v1326_v20  ;;  %1274 = vmatprep.mubr.msk.bf16.mxu1 %vm404_vm0, %v1327_v21 }
  0x36   : > { %1243 = vmatmul.mubr.msk.bf16.gmra.mrb[16].mxu0 %vm404_vm0, %v1328_v22  ;;  %1275 = vmatmul.mubr.msk.bf16.gmra.mrb[16].mxu1 %vm404_vm0, %v1329_v23 }
  0x37   : > { %1246 = vmatprep.mubr.msk.bf16.mxu0 %vm404_vm0, %v1330_v24  ;;  %1278 = vmatprep.mubr.msk.bf16.mxu1 %vm404_vm0, %v1331_v25 }
  0x3e   : > { %1247 = vmatmul.mubr.msk.bf16.gmra.mrb[20].mxu0 %vm404_vm0, %v1332_v26  ;;  %1279 = vmatmul.mubr.msk.bf16.gmra.mrb[20].mxu1 %vm404_vm0, %v1333_v27 }
  0x3f   : > { %1250 = vmatprep.mubr.msk.bf16.mxu0 %vm404_vm0, %v1334_v28  ;;  %1282 = vmatprep.mubr.msk.bf16.mxu1 %vm404_vm0, %v1335_v29 }
  0x46   : > { %1251 = vmatmul.mubr.msk.bf16.gmra.mrb[24].mxu0 %vm404_vm0, %v1336_v30  ;;  %1283 = vmatmul.mubr.msk.bf16.gmra.mrb[24].mxu1 %vm404_vm0, %v1337_v31 }
  0x47   : > { %1254 = vmatprep.mubr.msk.bf16.mxu0 %vm404_vm0, %v1338_v32  ;;  %1286 = vmatprep.mubr.msk.bf16.mxu1 %vm404_vm0, %v1339_v33 }
  0x4e   : > { %1255 = vmatmul.mubr.msk.bf16.gmra.mrb[28].mxu0 %vm404_vm0, %v1340_v34  ;;  %1287 = vmatmul.mubr.msk.bf16.gmra.mrb[28].mxu1 %vm404_vm0, %v1341_v35 }
  0xe9   : > { %v1228_v36 = vpop.f32.mrb[0].mxu0  ;;  %v1260_v37 = vpop.f32.mrb[0].mxu1 }
  0xea   : > { %vm792_vm2 = vcmp.ge.f32.partialorder %v1228_v36, 0.0  ;;  %v856_v38 = vmul.f32 0.2, %v1228_v36  ;;  %vm824_vm3 = vcmp.ge.f32.partialorder %v1260_v37, 0.0  ;;  %v888_v39 = vmul.f32 0.2, %v1260_v37 }
  0xeb   : > { %v535_v40 = vpop.f32.mrb[1].mxu0  ;;  %v663_v41 = vpop.f32.mrb[1].mxu1 }
  0xec   : > { %v920_v42 = vsel %vm792_vm2, %v1228_v36, %v856_v38  ;;  %v952_v43 = vsel %vm824_vm3, %v1260_v37, %v888_v39  ;;  %vm790_vm4 = vcmp.ge.f32.partialorder %v535_v40, 0.0  ;;  %v854_v44 = vmul.f32 0.2, %v535_v40  ;;  %v1229_v45 = vpop.f32.mrb[2].mxu0  ;;  %v1261_v46 = vpop.f32.mrb[2].mxu1 }
  0xed   : > { %985 = vst.msk [vmem:[%s1461_s27 + $0x10] sm:$0xff] %vm982_vm1, %v920_v42  ;;  %1017 = vst.msk [vmem:[%s1461_s27 + $0x110] sm:$0xff] %vm982_vm1, %v952_v43  ;;  %vm822_vm5 = vcmp.ge.f32.partialorder %v663_v41, 0.0  ;;  %v886_v47 = vmul.f32 0.2, %v663_v41  ;;  %vm793_vm6 = vcmp.ge.f32.partialorder %v1229_v45, 0.0 }
  0xee   : > { %v857_v48 = vmul.f32 0.2, %v1229_v45  ;;  %v918_v49 = vsel %vm790_vm4, %v535_v40, %v854_v44  ;;  %vm825_vm7 = vcmp.ge.f32.partialorder %v1261_v46, 0.0  ;;  %v889_v50 = vmul.f32 0.2, %v1261_v46  ;;  %v538_v51 = vpop.f32.mrb[3].mxu0 }
  0xef   : > { %v666_v52 = vpop.f32.mrb[3].mxu1  ;;  %983 = vst.msk [vmem:[%s1461_s27] sm:$0xff] %vm982_vm1, %v918_v49  ;;  %v950_v53 = vsel %vm822_vm5, %v663_v41, %v886_v47  ;;  %vm791_vm8 = vcmp.ge.f32.partialorder %v538_v51, 0.0  ;;  %v855_v55 = vmul.f32 0.2, %v538_v51 }
  0xf0   : > { %v921_v54 = vsel %vm793_vm6, %v1229_v45, %v857_v48  ;;  %1015 = vst.msk [vmem:[%s1461_s27 + $0x100] sm:$0xff] %vm982_vm1, %v950_v53  ;;  %v953_v56 = vsel %vm825_vm7, %v1261_v46, %v889_v50  ;;  %vm823_vm9 = vcmp.ge.f32.partialorder %v666_v52, 0.0  ;;  %v887_v57 = vmul.f32 0.2, %v666_v52 }
  0xf1   : > { %986 = vst.msk [vmem:[%s1461_s27 + $0x18] sm:$0xff] %vm982_vm1, %v921_v54  ;;  %1018 = vst.msk [vmem:[%s1461_s27 + $0x118] sm:$0xff] %vm982_vm1, %v953_v56  ;;  %v919_v58 = vsel %vm791_vm8, %v538_v51, %v855_v55  ;;  %v1232_v59 = vpop.f32.mrb[4].mxu0  ;;  %v1264_v60 = vpop.f32.mrb[4].mxu1 }
  0xf2   : > { %984 = vst.msk [vmem:[%s1461_s27 + $0x8] sm:$0xff] %vm982_vm1, %v919_v58  ;;  %v951_v61 = vsel %vm823_vm9, %v666_v52, %v887_v57  ;;  %vm796_vm10 = vcmp.ge.f32.partialorder %v1232_v59, 0.0  ;;  %v860_v62 = vmul.f32 0.2, %v1232_v59  ;;  %vm828_vm11 = vcmp.ge.f32.partialorder %v1264_v60, 0.0  ;;  %v551_v63 = vpop.f32.mrb[5].mxu0 }
  0xf3   : > { %v679_v0 = vpop.f32.mrb[5].mxu1  ;;  %1016 = vst.msk [vmem:[%s1461_s27 + $0x108] sm:$0xff] %vm982_vm1, %v951_v61  ;;  %v892_v1 = vmul.f32 0.2, %v1264_v60  ;;  %vm794_vm12 = vcmp.ge.f32.partialorder %v551_v63, 0.0  ;;  %v1233_v5 = vpop.f32.mrb[6].mxu0 }
  0xf4   : > { %v858_v2 = vmul.f32 0.2, %v551_v63  ;;  %vm826_vm13 = vcmp.ge.f32.partialorder %v679_v0, 0.0  ;;  %v924_v3 = vsel %vm796_vm10, %v1232_v59, %v860_v62  ;;  %v890_v4 = vmul.f32 0.2, %v679_v0  ;;  %v1265_v6 = vpop.f32.mrb[6].mxu1 }
  0xf5   : > { %989 = vst.msk [vmem:[%s1461_s27 + $0x30] sm:$0xff] %vm982_vm1, %v924_v3  ;;  %v956_v7 = vsel %vm828_vm11, %v1264_v60, %v892_v1  ;;  %vm797_vm14 = vcmp.ge.f32.partialorder %v1233_v5, 0.0  ;;  %v861_v9 = vmul.f32 0.2, %v1233_v5  ;;  %v554_v10 = vpop.f32.mrb[7].mxu0  ;;  %v682_v11 = vpop.f32.mrb[7].mxu1 }
  0xf6   : > { %v922_v8 = vsel %vm794_vm12, %v551_v63, %v858_v2  ;;  %1021 = vst.msk [vmem:[%s1461_s27 + $0x130] sm:$0xff] %vm982_vm1, %v956_v7  ;;  %v954_v12 = vsel %vm826_vm13, %v679_v0, %v890_v4  ;;  %vm829_vm15 = vcmp.ge.f32.partialorder %v1265_v6, 0.0  ;;  %v893_v13 = vmul.f32 0.2, %v1265_v6 }
  0xf7   : > { %987 = vst.msk [vmem:[%s1461_s27 + $0x20] sm:$0xff] %vm982_vm1, %v922_v8  ;;  %vm795_vm0 = vcmp.ge.f32.partialorder %v554_v10, 0.0  ;;  %1019 = vst.msk [vmem:[%s1461_s27 + $0x120] sm:$0xff] %vm982_vm1, %v954_v12  ;;  %v925_v14 = vsel %vm797_vm14, %v1233_v5, %v861_v9  ;;  %v859_v15 = vmul.f32 0.2, %v554_v10  ;;  %vm827_vm2 = vcmp.ge.f32.partialorder %v682_v11, 0.0 }
  0xf8   : > { %v891_v16 = vmul.f32 0.2, %v682_v11  ;;  %990 = vst.msk [vmem:[%s1461_s27 + $0x38] sm:$0xff] %vm982_vm1, %v925_v14  ;;  %v957_v17 = vsel %vm829_vm15, %v1265_v6, %v893_v13 }
  0xf9   : > { %1022 = vst.msk [vmem:[%s1461_s27 + $0x138] sm:$0xff] %vm982_vm1, %v957_v17  ;;  %v923_v18 = vsel %vm795_vm0, %v554_v10, %v859_v15  ;;  %v1236_v20 = vpop.f32.mrb[8].mxu0  ;;  %v1268_v21 = vpop.f32.mrb[8].mxu1 }
  0xfa   : > { %v955_v19 = vsel %vm827_vm2, %v682_v11, %v891_v16  ;;  %988 = vst.msk [vmem:[%s1461_s27 + $0x28] sm:$0xff] %vm982_vm1, %v923_v18  ;;  %vm800_vm3 = vcmp.ge.f32.partialorder %v1236_v20, 0.0  ;;  %v864_v22 = vmul.f32 0.2, %v1236_v20  ;;  %vm832_vm4 = vcmp.ge.f32.partialorder %v1268_v21, 0.0  ;;  %v567_v24 = vpop.f32.mrb[9].mxu0 }
  0xfb   : > { %1020 = vst.msk [vmem:[%s1461_s27 + $0x128] sm:$0xff] %vm982_vm1, %v955_v19  ;;  %v896_v23 = vmul.f32 0.2, %v1268_v21  ;;  %v695_v25 = vpop.f32.mrb[9].mxu1  ;;  %vm798_vm5 = vcmp.ge.f32.partialorder %v567_v24, 0.0  ;;  %v1237_v29 = vpop.f32.mrb[10].mxu0 }
  0xfc   : > { %v928_v26 = vsel %vm800_vm3, %v1236_v20, %v864_v22  ;;  %v862_v28 = vmul.f32 0.2, %v567_v24  ;;  %v1269_v30 = vpop.f32.mrb[10].mxu1  ;;  %vm830_vm6 = vcmp.ge.f32.partialorder %v695_v25, 0.0  ;;  %v894_v31 = vmul.f32 0.2, %v695_v25 }
  0xfd   : > { %v960_v27 = vsel %vm832_vm4, %v1268_v21, %v896_v23  ;;  %993 = vst.msk [vmem:[%s1461_s27 + $0x50] sm:$0xff] %vm982_vm1, %v928_v26  ;;  %vm801_vm7 = vcmp.ge.f32.partialorder %v1237_v29, 0.0  ;;  %v865_v32 = vmul.f32 0.2, %v1237_v29  ;;  %vm833_vm8 = vcmp.ge.f32.partialorder %v1269_v30, 0.0  ;;  %v570_v35 = vpop.f32.mrb[11].mxu0 }
  0xfe   : > { %1025 = vst.msk [vmem:[%s1461_s27 + $0x150] sm:$0xff] %vm982_vm1, %v960_v27  ;;  %v926_v33 = vsel %vm798_vm5, %v567_v24, %v862_v28  ;;  %v897_v34 = vmul.f32 0.2, %v1269_v30  ;;  %v698_v36 = vpop.f32.mrb[11].mxu1  ;;  %v958_v37 = vsel %vm830_vm6, %v695_v25, %v894_v31  ;;  %vm799_vm9 = vcmp.ge.f32.partialorder %v570_v35, 0.0 }
  0xff   : > { %991 = vst.msk [vmem:[%s1461_s27 + $0x40] sm:$0xff] %vm982_vm1, %v926_v33  ;;  %v929_v38 = vsel %vm801_vm7, %v1237_v29, %v865_v32  ;;  %v863_v39 = vmul.f32 0.2, %v570_v35  ;;  %1023 = vst.msk [vmem:[%s1461_s27 + $0x140] sm:$0xff] %vm982_vm1, %v958_v37  ;;  %vm831_vm10 = vcmp.ge.f32.partialorder %v698_v36, 0.0 }
 0x100   : > { %994 = vst.msk [vmem:[%s1461_s27 + $0x58] sm:$0xff] %vm982_vm1, %v929_v38  ;;  %v961_v40 = vsel %vm833_vm8, %v1269_v30, %v897_v34  ;;  %v895_v41 = vmul.f32 0.2, %v698_v36 }
 0x101   : > { %1026 = vst.msk [vmem:[%s1461_s27 + $0x158] sm:$0xff] %vm982_vm1, %v961_v40  ;;  %v927_v42 = vsel %vm799_vm9, %v570_v35, %v863_v39  ;;  %v1240_v43 = vpop.f32.mrb[12].mxu0  ;;  %v1272_v44 = vpop.f32.mrb[12].mxu1 }
 0x102   : > { %992 = vst.msk [vmem:[%s1461_s27 + $0x48] sm:$0xff] %vm982_vm1, %v927_v42  ;;  %v959_v45 = vsel %vm831_vm10, %v698_v36, %v895_v41  ;;  %vm804_vm11 = vcmp.ge.f32.partialorder %v1240_v43, 0.0  ;;  %v868_v46 = vmul.f32 0.2, %v1240_v43  ;;  %vm836_vm12 = vcmp.ge.f32.partialorder %v1272_v44, 0.0  ;;  %v583_v47 = vpop.f32.mrb[13].mxu0 }
 0x103   : > { %v711_v48 = vpop.f32.mrb[13].mxu1  ;;  %1024 = vst.msk [vmem:[%s1461_s27 + $0x148] sm:$0xff] %vm982_vm1, %v959_v45  ;;  %v900_v49 = vmul.f32 0.2, %v1272_v44  ;;  %vm802_vm13 = vcmp.ge.f32.partialorder %v583_v47, 0.0  ;;  %v1241_v53 = vpop.f32.mrb[14].mxu0 }
 0x104   : > { %v866_v50 = vmul.f32 0.2, %v583_v47  ;;  %vm834_vm14 = vcmp.ge.f32.partialorder %v711_v48, 0.0  ;;  %v932_v51 = vsel %vm804_vm11, %v1240_v43, %v868_v46  ;;  %v898_v52 = vmul.f32 0.2, %v711_v48  ;;  %v1273_v54 = vpop.f32.mrb[14].mxu1 }
 0x105   : > { %997 = vst.msk [vmem:[%s1461_s27 + $0x70] sm:$0xff] %vm982_vm1, %v932_v51  ;;  %v964_v55 = vsel %vm836_vm12, %v1272_v44, %v900_v49  ;;  %vm805_vm15 = vcmp.ge.f32.partialorder %v1241_v53, 0.0  ;;  %v869_v57 = vmul.f32 0.2, %v1241_v53  ;;  %v586_v58 = vpop.f32.mrb[15].mxu0  ;;  %v714_v59 = vpop.f32.mrb[15].mxu1 }
 0x106   : > { %v930_v56 = vsel %vm802_vm13, %v583_v47, %v866_v50  ;;  %1029 = vst.msk [vmem:[%s1461_s27 + $0x170] sm:$0xff] %vm982_vm1, %v964_v55  ;;  %v962_v60 = vsel %vm834_vm14, %v711_v48, %v898_v52  ;;  %vm837_vm0 = vcmp.ge.f32.partialorder %v1273_v54, 0.0  ;;  %v901_v61 = vmul.f32 0.2, %v1273_v54 }
 0x107   : > { %995 = vst.msk [vmem:[%s1461_s27 + $0x60] sm:$0xff] %vm982_vm1, %v930_v56  ;;  %vm803_vm2 = vcmp.ge.f32.partialorder %v586_v58, 0.0  ;;  %1027 = vst.msk [vmem:[%s1461_s27 + $0x160] sm:$0xff] %vm982_vm1, %v962_v60  ;;  %v933_v62 = vsel %vm805_vm15, %v1241_v53, %v869_v57  ;;  %v867_v63 = vmul.f32 0.2, %v586_v58  ;;  %vm835_vm3 = vcmp.ge.f32.partialorder %v714_v59, 0.0 }
 0x108   : > { %v899_v0 = vmul.f32 0.2, %v714_v59  ;;  %998 = vst.msk [vmem:[%s1461_s27 + $0x78] sm:$0xff] %vm982_vm1, %v933_v62  ;;  %v965_v1 = vsel %vm837_vm0, %v1273_v54, %v901_v61 }
 0x109   : > { %1030 = vst.msk [vmem:[%s1461_s27 + $0x178] sm:$0xff] %vm982_vm1, %v965_v1  ;;  %v931_v2 = vsel %vm803_vm2, %v586_v58, %v867_v63  ;;  %v1244_v4 = vpop.f32.mrb[16].mxu0  ;;  %v1276_v5 = vpop.f32.mrb[16].mxu1 }
 0x10a   : > { %v963_v3 = vsel %vm835_vm3, %v714_v59, %v899_v0  ;;  %996 = vst.msk [vmem:[%s1461_s27 + $0x68] sm:$0xff] %vm982_vm1, %v931_v2  ;;  %vm808_vm4 = vcmp.ge.f32.partialorder %v1244_v4, 0.0  ;;  %v872_v6 = vmul.f32 0.2, %v1244_v4  ;;  %vm840_vm5 = vcmp.ge.f32.partialorder %v1276_v5, 0.0  ;;  %v599_v8 = vpop.f32.mrb[17].mxu0 }
 0x10b   : > { %1028 = vst.msk [vmem:[%s1461_s27 + $0x168] sm:$0xff] %vm982_vm1, %v963_v3  ;;  %v904_v7 = vmul.f32 0.2, %v1276_v5  ;;  %v727_v9 = vpop.f32.mrb[17].mxu1  ;;  %vm806_vm6 = vcmp.ge.f32.partialorder %v599_v8, 0.0  ;;  %v1245_v13 = vpop.f32.mrb[18].mxu0 }
 0x10c   : > { %v936_v10 = vsel %vm808_vm4, %v1244_v4, %v872_v6  ;;  %v870_v12 = vmul.f32 0.2, %v599_v8  ;;  %v1277_v14 = vpop.f32.mrb[18].mxu1  ;;  %vm838_vm7 = vcmp.ge.f32.partialorder %v727_v9, 0.0  ;;  %v902_v15 = vmul.f32 0.2, %v727_v9 }
 0x10d   : > { %v968_v11 = vsel %vm840_vm5, %v1276_v5, %v904_v7  ;;  %1001 = vst.msk [vmem:[%s1461_s27 + $0x90] sm:$0xff] %vm982_vm1, %v936_v10  ;;  %vm809_vm8 = vcmp.ge.f32.partialorder %v1245_v13, 0.0  ;;  %v873_v16 = vmul.f32 0.2, %v1245_v13  ;;  %vm841_vm9 = vcmp.ge.f32.partialorder %v1277_v14, 0.0  ;;  %v602_v19 = vpop.f32.mrb[19].mxu0 }
 0x10e   : > { %1033 = vst.msk [vmem:[%s1461_s27 + $0x190] sm:$0xff] %vm982_vm1, %v968_v11  ;;  %v934_v17 = vsel %vm806_vm6, %v599_v8, %v870_v12  ;;  %v905_v18 = vmul.f32 0.2, %v1277_v14  ;;  %v730_v20 = vpop.f32.mrb[19].mxu1  ;;  %v966_v21 = vsel %vm838_vm7, %v727_v9, %v902_v15  ;;  %vm807_vm10 = vcmp.ge.f32.partialorder %v602_v19, 0.0 }
 0x10f   : > { %999 = vst.msk [vmem:[%s1461_s27 + $0x80] sm:$0xff] %vm982_vm1, %v934_v17  ;;  %v937_v22 = vsel %vm809_vm8, %v1245_v13, %v873_v16  ;;  %v871_v23 = vmul.f32 0.2, %v602_v19  ;;  %1031 = vst.msk [vmem:[%s1461_s27 + $0x180] sm:$0xff] %vm982_vm1, %v966_v21  ;;  %vm839_vm11 = vcmp.ge.f32.partialorder %v730_v20, 0.0 }
 0x110   : > { %1002 = vst.msk [vmem:[%s1461_s27 + $0x98] sm:$0xff] %vm982_vm1, %v937_v22  ;;  %v969_v24 = vsel %vm841_vm9, %v1277_v14, %v905_v18  ;;  %v903_v25 = vmul.f32 0.2, %v730_v20 }
 0x111   : > { %1034 = vst.msk [vmem:[%s1461_s27 + $0x198] sm:$0xff] %vm982_vm1, %v969_v24  ;;  %v935_v26 = vsel %vm807_vm10, %v602_v19, %v871_v23  ;;  %v1248_v27 = vpop.f32.mrb[20].mxu0  ;;  %v1280_v28 = vpop.f32.mrb[20].mxu1 }
 0x112   : > { %1000 = vst.msk [vmem:[%s1461_s27 + $0x88] sm:$0xff] %vm982_vm1, %v935_v26  ;;  %v967_v29 = vsel %vm839_vm11, %v730_v20, %v903_v25  ;;  %vm812_vm12 = vcmp.ge.f32.partialorder %v1248_v27, 0.0  ;;  %v876_v30 = vmul.f32 0.2, %v1248_v27  ;;  %vm844_vm13 = vcmp.ge.f32.partialorder %v1280_v28, 0.0  ;;  %v615_v31 = vpop.f32.mrb[21].mxu0 }
 0x113   : > { %v743_v32 = vpop.f32.mrb[21].mxu1  ;;  %1032 = vst.msk [vmem:[%s1461_s27 + $0x188] sm:$0xff] %vm982_vm1, %v967_v29  ;;  %v908_v33 = vmul.f32 0.2, %v1280_v28  ;;  %vm810_vm14 = vcmp.ge.f32.partialorder %v615_v31, 0.0  ;;  %v1249_v37 = vpop.f32.mrb[22].mxu0 }
 0x114   : > { %v874_v34 = vmul.f32 0.2, %v615_v31  ;;  %vm842_vm15 = vcmp.ge.f32.partialorder %v743_v32, 0.0  ;;  %v940_v35 = vsel %vm812_vm12, %v1248_v27, %v876_v30  ;;  %v906_v36 = vmul.f32 0.2, %v743_v32  ;;  %v1281_v38 = vpop.f32.mrb[22].mxu1 }
 0x115   : > { %1005 = vst.msk [vmem:[%s1461_s27 + $0xb0] sm:$0xff] %vm982_vm1, %v940_v35  ;;  %v972_v39 = vsel %vm844_vm13, %v1280_v28, %v908_v33  ;;  %vm813_vm0 = vcmp.ge.f32.partialorder %v1249_v37, 0.0  ;;  %v877_v41 = vmul.f32 0.2, %v1249_v37  ;;  %v618_v42 = vpop.f32.mrb[23].mxu0  ;;  %v746_v43 = vpop.f32.mrb[23].mxu1 }
 0x116   : > { %v938_v40 = vsel %vm810_vm14, %v615_v31, %v874_v34  ;;  %1037 = vst.msk [vmem:[%s1461_s27 + $0x1b0] sm:$0xff] %vm982_vm1, %v972_v39  ;;  %v970_v44 = vsel %vm842_vm15, %v743_v32, %v906_v36  ;;  %vm845_vm2 = vcmp.ge.f32.partialorder %v1281_v38, 0.0  ;;  %v909_v45 = vmul.f32 0.2, %v1281_v38 }
 0x117   : > { %1003 = vst.msk [vmem:[%s1461_s27 + $0xa0] sm:$0xff] %vm982_vm1, %v938_v40  ;;  %vm811_vm3 = vcmp.ge.f32.partialorder %v618_v42, 0.0  ;;  %1035 = vst.msk [vmem:[%s1461_s27 + $0x1a0] sm:$0xff] %vm982_vm1, %v970_v44  ;;  %v941_v46 = vsel %vm813_vm0, %v1249_v37, %v877_v41  ;;  %v875_v47 = vmul.f32 0.2, %v618_v42  ;;  %vm843_vm4 = vcmp.ge.f32.partialorder %v746_v43, 0.0 }
 0x118   : > { %v907_v48 = vmul.f32 0.2, %v746_v43  ;;  %1006 = vst.msk [vmem:[%s1461_s27 + $0xb8] sm:$0xff] %vm982_vm1, %v941_v46  ;;  %v973_v49 = vsel %vm845_vm2, %v1281_v38, %v909_v45 }
 0x119   : > { %1038 = vst.msk [vmem:[%s1461_s27 + $0x1b8] sm:$0xff] %vm982_vm1, %v973_v49  ;;  %v939_v50 = vsel %vm811_vm3, %v618_v42, %v875_v47  ;;  %v1252_v52 = vpop.f32.mrb[24].mxu0  ;;  %v1284_v53 = vpop.f32.mrb[24].mxu1 }
 0x11a   : > { %v971_v51 = vsel %vm843_vm4, %v746_v43, %v907_v48  ;;  %1004 = vst.msk [vmem:[%s1461_s27 + $0xa8] sm:$0xff] %vm982_vm1, %v939_v50  ;;  %vm816_vm5 = vcmp.ge.f32.partialorder %v1252_v52, 0.0  ;;  %v880_v54 = vmul.f32 0.2, %v1252_v52  ;;  %vm848_vm6 = vcmp.ge.f32.partialorder %v1284_v53, 0.0  ;;  %v631_v56 = vpop.f32.mrb[25].mxu0 }
 0x11b   : > { %1036 = vst.msk [vmem:[%s1461_s27 + $0x1a8] sm:$0xff] %vm982_vm1, %v971_v51  ;;  %v912_v55 = vmul.f32 0.2, %v1284_v53  ;;  %v759_v57 = vpop.f32.mrb[25].mxu1  ;;  %vm814_vm7 = vcmp.ge.f32.partialorder %v631_v56, 0.0  ;;  %v1253_v61 = vpop.f32.mrb[26].mxu0 }
 0x11c   : > { %v944_v58 = vsel %vm816_vm5, %v1252_v52, %v880_v54  ;;  %v878_v60 = vmul.f32 0.2, %v631_v56  ;;  %v1285_v62 = vpop.f32.mrb[26].mxu1  ;;  %vm846_vm8 = vcmp.ge.f32.partialorder %v759_v57, 0.0  ;;  %v910_v63 = vmul.f32 0.2, %v759_v57 }
 0x11d   : > { %v976_v59 = vsel %vm848_vm6, %v1284_v53, %v912_v55  ;;  %1009 = vst.msk [vmem:[%s1461_s27 + $0xd0] sm:$0xff] %vm982_vm1, %v944_v58  ;;  %vm817_vm9 = vcmp.ge.f32.partialorder %v1253_v61, 0.0  ;;  %v881_v0 = vmul.f32 0.2, %v1253_v61  ;;  %vm849_vm10 = vcmp.ge.f32.partialorder %v1285_v62, 0.0  ;;  %v634_v3 = vpop.f32.mrb[27].mxu0 }
 0x11e   : > { %1041 = vst.msk [vmem:[%s1461_s27 + $0x1d0] sm:$0xff] %vm982_vm1, %v976_v59  ;;  %v942_v1 = vsel %vm814_vm7, %v631_v56, %v878_v60  ;;  %v913_v2 = vmul.f32 0.2, %v1285_v62  ;;  %v762_v4 = vpop.f32.mrb[27].mxu1  ;;  %v974_v5 = vsel %vm846_vm8, %v759_v57, %v910_v63  ;;  %vm815_vm11 = vcmp.ge.f32.partialorder %v634_v3, 0.0 }
 0x11f   : > { %1007 = vst.msk [vmem:[%s1461_s27 + $0xc0] sm:$0xff] %vm982_vm1, %v942_v1  ;;  %v945_v6 = vsel %vm817_vm9, %v1253_v61, %v881_v0  ;;  %v879_v7 = vmul.f32 0.2, %v634_v3  ;;  %1039 = vst.msk [vmem:[%s1461_s27 + $0x1c0] sm:$0xff] %vm982_vm1, %v974_v5  ;;  %vm847_vm12 = vcmp.ge.f32.partialorder %v762_v4, 0.0 }
 0x120   : > { %1010 = vst.msk [vmem:[%s1461_s27 + $0xd8] sm:$0xff] %vm982_vm1, %v945_v6  ;;  %v977_v8 = vsel %vm849_vm10, %v1285_v62, %v913_v2  ;;  %v911_v9 = vmul.f32 0.2, %v762_v4 }
 0x121   : > { %1042 = vst.msk [vmem:[%s1461_s27 + $0x1d8] sm:$0xff] %vm982_vm1, %v977_v8  ;;  %v943_v10 = vsel %vm815_vm11, %v634_v3, %v879_v7  ;;  %v1256_v11 = vpop.f32.mrb[28].mxu0  ;;  %v1288_v12 = vpop.f32.mrb[28].mxu1 }
 0x122   : > { %1008 = vst.msk [vmem:[%s1461_s27 + $0xc8] sm:$0xff] %vm982_vm1, %v943_v10  ;;  %v975_v13 = vsel %vm847_vm12, %v762_v4, %v911_v9  ;;  %vm820_vm13 = vcmp.ge.f32.partialorder %v1256_v11, 0.0  ;;  %v884_v14 = vmul.f32 0.2, %v1256_v11  ;;  %vm852_vm14 = vcmp.ge.f32.partialorder %v1288_v12, 0.0  ;;  %v647_v15 = vpop.f32.mrb[29].mxu0 }
 0x123   : > { %v775_v16 = vpop.f32.mrb[29].mxu1  ;;  %1040 = vst.msk [vmem:[%s1461_s27 + $0x1c8] sm:$0xff] %vm982_vm1, %v975_v13  ;;  %v916_v17 = vmul.f32 0.2, %v1288_v12  ;;  %vm818_vm15 = vcmp.ge.f32.partialorder %v647_v15, 0.0  ;;  %v1257_v21 = vpop.f32.mrb[30].mxu0 }
 0x124   : > { %v882_v18 = vmul.f32 0.2, %v647_v15  ;;  %vm850_vm0 = vcmp.ge.f32.partialorder %v775_v16, 0.0  ;;  %v948_v19 = vsel %vm820_vm13, %v1256_v11, %v884_v14  ;;  %v914_v20 = vmul.f32 0.2, %v775_v16  ;;  %v1289_v22 = vpop.f32.mrb[30].mxu1 }
 0x125   : > { %1013 = vst.msk [vmem:[%s1461_s27 + $0xf0] sm:$0xff] %vm982_vm1, %v948_v19  ;;  %v980_v23 = vsel %vm852_vm14, %v1288_v12, %v916_v17  ;;  %vm821_vm2 = vcmp.ge.f32.partialorder %v1257_v21, 0.0  ;;  %v885_v25 = vmul.f32 0.2, %v1257_v21  ;;  %v650_v26 = vpop.f32.mrb[31].mxu0  ;;  %v778_v27 = vpop.f32.mrb[31].mxu1 }
 0x126   : > { %v946_v24 = vsel %vm818_vm15, %v647_v15, %v882_v18  ;;  %1045 = vst.msk [vmem:[%s1461_s27 + $0x1f0] sm:$0xff] %vm982_vm1, %v980_v23  ;;  %v978_v28 = vsel %vm850_vm0, %v775_v16, %v914_v20  ;;  %vm853_vm3 = vcmp.ge.f32.partialorder %v1289_v22, 0.0  ;;  %v917_v29 = vmul.f32 0.2, %v1289_v22 }
 0x127   : > { %1011 = vst.msk [vmem:[%s1461_s27 + $0xe0] sm:$0xff] %vm982_vm1, %v946_v24  ;;  %vm819_vm4 = vcmp.ge.f32.partialorder %v650_v26, 0.0  ;;  %1043 = vst.msk [vmem:[%s1461_s27 + $0x1e0] sm:$0xff] %vm982_vm1, %v978_v28  ;;  %v949_v30 = vsel %vm821_vm2, %v1257_v21, %v885_v25  ;;  %v883_v31 = vmul.f32 0.2, %v650_v26  ;;  %vm851_vm5 = vcmp.ge.f32.partialorder %v778_v27, 0.0 }
 0x128   : > { %v915_v32 = vmul.f32 0.2, %v778_v27  ;;  %1014 = vst.msk [vmem:[%s1461_s27 + $0xf8] sm:$0xff] %vm982_vm1, %v949_v30  ;;  %v981_v33 = vsel %vm853_vm3, %v1289_v22, %v917_v29 }
 0x129   : > { %1046 = vst.msk [vmem:[%s1461_s27 + $0x1f8] sm:$0xff] %vm982_vm1, %v981_v33  ;;  %v947_v34 = vsel %vm819_vm4, %v650_v26, %v883_v31 }
 0x12a   : > { %v979_v35 = vsel %vm851_vm5, %v778_v27, %v915_v32  ;;  %1012 = vst.msk [vmem:[%s1461_s27 + $0xe8] sm:$0xff] %vm982_vm1, %v947_v34 }
 0x12b   : > { %1044 = vst.msk [vmem:[%s1461_s27 + $0x1e8] sm:$0xff] %vm982_vm1, %v979_v35 }
 0x12c PF: > { %s12_s9 = sadd.s32 1, %s1348_s9  }
 0x12d   : > { %p9_p4 = scmp.ge.s32.totalorder %s12_s9, 4  }
 0x12f   :  { %11 = sbr.rel (!%p9_p4) target bundleno = 1 (0x1), region = 58 }

</bundles_post_ra>
